<compile_context>
chip_gen: v5e
topology: v5e:2x2
jax: 0.10.0
libtpu: 0.0.40
codegen_flags: <defaults>
</compile_context>

<pallas_src>
import functools

import jax
import jax.numpy as jnp
from jax.experimental import pallas as pl
from jax.experimental.pallas import tpu as pltpu

DIVISOR = 2.0
NEG_SLOPE = 0.01
IN_CHANNELS = 3
OUT_CHANNELS = 16
KERNEL_SIZE = 3


def _conv_div_leaky_kernel(x_ref, w_ref, b_ref, o_ref, *, img_w, ksize, neg_slope):
    # x_ref: (C_in, N*H*W)        flattened batch-folded image slab (f32)
    # w_ref: (C_out, K*K*C_in)    weights pre-scaled by 1/divisor, tap-major rows
    # b_ref: (C_out, 1)           bias pre-scaled by 1/divisor
    # o_ref: (C_out, N*H*W)       channel-major output slab (valid window is a
    #                             subset; garbage columns sliced off outside)
    xv = x_ref[...]                             # (C_in, NHW) resident in VMEM
    nhw = xv.shape[-1]

    # Build the (K*K*C_in, NHW) im2col rhs with XLU lane-rolls (no HBM traffic,
    # no expanded patches array).  Row order: (dy*K + dx)*C_in + c.
    slabs = []
    for dy in range(ksize):
        for dx in range(ksize):
            s = dy * img_w + dx
            # shifted[c, p] == xv[c, p + s] for all valid output positions p;
            # wrap-around / cross-batch bleed only hits discarded columns.
            shifted = xv if s == 0 else pltpu.roll(xv, shift=nhw - s, axis=1)
            slabs.append(shifted)
    rhs = jnp.concatenate(slabs, axis=0)        # (K*K*C_in, NHW)

    # Single MXU pass for the whole convolution.
    acc = jnp.dot(w_ref[...], rhs, preferred_element_type=jnp.float32)
    acc = acc + b_ref[...]                      # bias broadcast over lanes
    o_ref[...] = jnp.where(acc > 0, acc, neg_slope * acc)


def conv_div_leaky_relu(x, weight, bias, *, divisor=DIVISOR, neg_slope=NEG_SLOPE):
    """x: (N, C_in, H, W) f32; weight: (C_out, C_in, K, K); bias: (C_out,)."""
    n, c_in, h, w = x.shape
    c_out, _, k, _ = weight.shape
    ho, wo = h - k + 1, w - k + 1
    hw = h * w
    nhw = n * hw

    # Fold batch into the lane axis: (N, C_in, H, W) -> (C_in, N*H*W).
    x_flat = jnp.transpose(x, (1, 0, 2, 3)).reshape(c_in, nhw).astype(jnp.float32)

    # Fold the divisor into the tiny parameters once; reorder the weight so the
    # kernel's im2col row order (tap-major, then input channel) matches.
    w_arr = (weight.astype(jnp.float32) / divisor)
    w_arr = jnp.transpose(w_arr, (0, 2, 3, 1)).reshape(c_out, k * k * c_in)
    b_arr = (bias.astype(jnp.float32) / divisor).reshape(c_out, 1)

    kernel = functools.partial(
        _conv_div_leaky_kernel, img_w=w, ksize=k, neg_slope=float(neg_slope))

    # Single step: whole arrays live in VMEM, no grid, no pipelining needed.
    out_flat = pl.pallas_call(
        kernel,
        out_shape=jax.ShapeDtypeStruct((c_out, nhw), jnp.float32),
        in_specs=[
            pl.BlockSpec((c_in, nhw), lambda: (0, 0)),
            pl.BlockSpec((c_out, k * k * c_in), lambda: (0, 0)),
            pl.BlockSpec((c_out, 1), lambda: (0, 0)),
        ],
        out_specs=pl.BlockSpec((c_out, nhw), lambda: (0, 0)),
    )(x_flat, w_arr, b_arr)

    # Channel-major slab -> (N, C_out, H, W), then keep the valid-conv window.
    out = out_flat.reshape(c_out, n, h, w).transpose(1, 0, 2, 3)
    return out[:, :, :ho, :wo]


def init_params(key, in_channels, out_channels, kernel_size):
    # Deterministic init mimicking PyTorch Conv2d defaults (uniform(-b, b)).
    k_w, k_b = jax.random.split(key)
    fan_in = in_channels * kernel_size * kernel_size
    bound = 1.0 / (fan_in ** 0.5)
    weight = jax.random.uniform(
        k_w, (out_channels, in_channels, kernel_size, kernel_size),
        minval=-bound, maxval=bound, dtype=jnp.float32)
    bias = jax.random.uniform(
        k_b, (out_channels,), minval=-bound, maxval=bound, dtype=jnp.float32)
    return weight, bias


if __name__ == "__main__":
    key = jax.random.PRNGKey(0)
    k_x, k_p = jax.random.split(key)

    N, H, W = 2, 16, 16
    x = jax.random.normal(k_x, (N, IN_CHANNELS, H, W), dtype=jnp.float32)
    weight, bias = init_params(k_p, IN_CHANNELS, OUT_CHANNELS, KERNEL_SIZE)

    fwd = jax.jit(conv_div_leaky_relu)
    out = jax.block_until_ready(fwd(x, weight, bias))

    # Reference: plain-JAX conv + div + leaky relu (matches the PyTorch module).
    ref = jax.lax.conv_general_dilated(
        x, weight, window_strides=(1, 1), padding="VALID",
        dimension_numbers=("NCHW", "OIHW", "NCHW"))
    ref = ref + bias.reshape(1, -1, 1, 1)
    ref = ref / DIVISOR
    ref = jnp.where(ref > 0, ref, NEG_SLOPE * ref)

    assert out.shape == (N, OUT_CHANNELS, H - KERNEL_SIZE + 1, W - KERNEL_SIZE + 1)
    assert jnp.allclose(out, ref, atol=1e-4, rtol=1e-4)
    print("KERNEL_OK")
</pallas_src>

<mosaic_0001>
module attributes {stable_mosaic.version = 11 : i64} {
  func.func @_conv_div_leaky_kernel(%arg0: memref<3x512xf32, #tpu.memory_space<vmem>>, %arg1: memref<16x27xf32, #tpu.memory_space<vmem>>, %arg2: memref<16x1xf32, #tpu.memory_space<vmem>>, %arg3: memref<16x512xf32, #tpu.memory_space<vmem>>) attributes {dimension_semantics = [], scalar_prefetch = 0 : i64, scratch_operands = 0 : i64, tpu.core_type = #tpu.core_type<tc>} {
    %c0 = arith.constant 0 : index
    %c0_0 = arith.constant 0 : index
    %0 = vector.load %arg0[%c0, %c0_0] : memref<3x512xf32, #tpu.memory_space<vmem>>, vector<3x512xf32>
    %c511_i32 = arith.constant 511 : i32
    %1 = tpu.dynamic_rotate %0 by %c511_i32 dim 1 : vector<3x512xf32>, i32 -> vector<3x512xf32>
    %c510_i32 = arith.constant 510 : i32
    %2 = tpu.dynamic_rotate %0 by %c510_i32 dim 1 : vector<3x512xf32>, i32 -> vector<3x512xf32>
    %c496_i32 = arith.constant 496 : i32
    %3 = tpu.dynamic_rotate %0 by %c496_i32 dim 1 : vector<3x512xf32>, i32 -> vector<3x512xf32>
    %c495_i32 = arith.constant 495 : i32
    %4 = tpu.dynamic_rotate %0 by %c495_i32 dim 1 : vector<3x512xf32>, i32 -> vector<3x512xf32>
    %c494_i32 = arith.constant 494 : i32
    %5 = tpu.dynamic_rotate %0 by %c494_i32 dim 1 : vector<3x512xf32>, i32 -> vector<3x512xf32>
    %c480_i32 = arith.constant 480 : i32
    %6 = tpu.dynamic_rotate %0 by %c480_i32 dim 1 : vector<3x512xf32>, i32 -> vector<3x512xf32>
    %c479_i32 = arith.constant 479 : i32
    %7 = tpu.dynamic_rotate %0 by %c479_i32 dim 1 : vector<3x512xf32>, i32 -> vector<3x512xf32>
    %c478_i32 = arith.constant 478 : i32
    %8 = tpu.dynamic_rotate %0 by %c478_i32 dim 1 : vector<3x512xf32>, i32 -> vector<3x512xf32>
    %9 = tpu.concatenate %0, %1, %2, %3, %4, %5, %6, %7, %8 in 0 : vector<3x512xf32>, vector<3x512xf32>, vector<3x512xf32>, vector<3x512xf32>, vector<3x512xf32>, vector<3x512xf32>, vector<3x512xf32>, vector<3x512xf32>, vector<3x512xf32> -> vector<27x512xf32>
    %c0_1 = arith.constant 0 : index
    %c0_2 = arith.constant 0 : index
    %10 = vector.load %arg1[%c0_1, %c0_2] : memref<16x27xf32, #tpu.memory_space<vmem>>, vector<16x27xf32>
    %cst = arith.constant dense<0.000000e+00> : vector<16x512xf32>
    %11 = tpu.matmul %10, %9, %cst {dimension_numbers = #tpu.dot_dimension_numbers<[1], [0], [0], [1], [0, 0, 1, 1], [], []>} : vector<16x27xf32>, vector<27x512xf32>, vector<16x512xf32> -> vector<16x512xf32>
    %c0_3 = arith.constant 0 : index
    %c0_4 = arith.constant 0 : index
    %12 = vector.load %arg2[%c0_3, %c0_4] : memref<16x1xf32, #tpu.memory_space<vmem>>, vector<16x1xf32>
    %13 = vector.broadcast %12 : vector<16x1xf32> to vector<16x512xf32>
    %14 = arith.addf %11, %13 : vector<16x512xf32>
    %cst_5 = arith.constant 0.000000e+00 : f32
    %15 = vector.broadcast %cst_5 : f32 to vector<16x512xf32>
    %16 = arith.cmpf ogt, %14, %15 : vector<16x512xf32>
    %cst_6 = arith.constant 0.00999999977 : f32
    %17 = vector.broadcast %cst_6 : f32 to vector<16x512xf32>
    %18 = arith.mulf %17, %14 : vector<16x512xf32>
    %19 = arith.select %16, %14, %18 : vector<16x512xi1>, vector<16x512xf32>
    %c0_7 = arith.constant 0 : index
    %c0_8 = arith.constant 0 : index
    %20 = vector.load %arg3[%c0_7, %c0_8] : memref<16x512xf32, #tpu.memory_space<vmem>>, vector<16x512xf32>
    tpu.vector_store %arg3[%c0_7, %c0_8], %19 {strides = array<i32>} : memref<16x512xf32, #tpu.memory_space<vmem>>, vector<16x512xf32>,
    return
  }
}

</mosaic_0001>

<bundles_post_ra>
// kernel: conv_div_leaky_relu.1
= control target key start
LH: loop header
LB: loop body
LE: loop exit
PB: predicated region body
PF: predicated region fallthrough
CT: control target
= control target key end

     0   :  { %s592_s16 = smov 127   ;;  %s594_s17 = smov 112   ;;  %v37_v52 = vlaneseq  ;;  %vm317_vm3 = vcmask 1040384   ;;  %vm332_vm7 = vcmask 1041408   ;;  %vm307_vm9 = vcmask 1042432   ;;  %s870_s0 = inlined_call_operand.vmem [shape: f32[3,512], index: 0, kind: input, shape index: {}]   ;;  %s871_s2 = inlined_call_operand.vmem [shape: f32[16,1], index: 2, kind: input, shape index: {}]   ;;  %s872_s1 = inlined_call_operand.vmem [shape: f32[16,27], index: 1, kind: input, shape index: {}]   ;;  %s873_s3 = inlined_call_operand.vmem [shape: f32[16,512], index: 3, kind: output, shape index: {}]  }
   0x1   :  { %v624_v0 = vld [vmem:[%s870_s0] sm:$0x77]  ;;  %v629_v1 = vld [vmem:[%s870_s0 + $0x8] sm:$0x77]  ;;  %s593_s0 = smov 126   ;;  %s595_s18 = smov 111  }
   0x2   :  { %18 = vst [vmem:[#allocation1] ss:$2 sm:$0xff] %v624_v0  ;;  %s596_s19 = smov 110   ;;  %s597_s20 = smov 96   ;;  %v660_v54 = vand.u32 127, %v37_v52  ;;  %vm322_vm10 = vcmask 1043456  }
   0x3   :  { %20 = vst [vmem:[#allocation1 + $0x10] ss:$2 sm:$0xff] %v629_v1  ;;  %s598_s21 = smov 95   ;;  %s599_s22 = smov 94   ;;  %vm337_vm11 = vcmask 1044480   ;;  %v344_v52 = vld [vmem:[%s871_s2] sm:$0xff] }
   0x4   :  { %vm63_vm0 = vcmp.lt.s32.totalorder %v660_v54, 126  ;;  %vm87_vm1 = vcmp.lt.s32.totalorder %v660_v54, 112  ;;  %vm111_vm2 = vcmp.lt.s32.totalorder %v660_v54, 111  ;;  %vm135_vm4 = vcmp.lt.s32.totalorder %v660_v54, 110 }
   0x5   :  { %vm159_vm5 = vcmp.lt.s32.totalorder %v660_v54, 96  ;;  %vm183_vm6 = vcmp.lt.s32.totalorder %v660_v54, 95  ;;  %vm207_vm8 = vcmp.lt.s32.totalorder %v660_v54, 94  ;;  %vm327_vm12 = vcmask 1046528  }
   0x6   :  { %vm39_vm13 = vcmp.lt.s32.totalorder %v660_v54, 127  ;;  %vm312_vm14 = vcmask 1045504   ;;  %vm356_vm15 = vcmask 220160  }
   0x9   :  { %v21_v2 = vld.sshfl [vmem:[#allocation1] sm:$0xff pattern:$0x75316420]  ;;  %v633_v3 = vld.sshfl [vmem:[#allocation1 + $0x8] sm:$0xff pattern:$0x75316420] }
   0xa   :  { %v23_v4 = vld.sshfl [vmem:[#allocation1 + $0x10] sm:$0xff pattern:$0x75316420]  ;;  %v635_v5 = vld.sshfl [vmem:[#allocation1 + $0x18] sm:$0xff pattern:$0x75316420] }
   0xb   :  { %46 = vst [vmem:[#allocation1 + $0x10] ss:$2 sm:$0xff] %v629_v1  ;;  %v524_v6 = vpack.i.bf16 %v23_v4, %v21_v2 }
   0xc   :  { %44 = vst [vmem:[#allocation1] ss:$2 sm:$0xff] %v624_v0 }
   0xd   :  { %525 = vrot.lane.b32.xlu0 %v524_v6, %s592_s16 }
  0x12   :  { %v49_v7 = vld.sshfl [vmem:[#allocation1 + $0x10] sm:$0xff pattern:$0x75316420]  ;;  %v50_v8 = vld.sshfl [vmem:[#allocation1 + $0x18] sm:$0xff pattern:$0x75316420] }
  0x13   :  { %70 = vst [vmem:[#allocation1 + $0x10] ss:$2 sm:$0xff] %v629_v1  ;;  %v47_v9 = vld.sshfl [vmem:[#allocation1] sm:$0xff pattern:$0x75316420] }
  0x14   :  { %v48_v10 = vld.sshfl [vmem:[#allocation1 + $0x8] sm:$0xff pattern:$0x75316420]  ;;  %v529_v11 = vpack.i.bf16 %v49_v7, %v47_v9 }
  0x15   :  { %68 = vst [vmem:[#allocation1] ss:$2 sm:$0xff] %v624_v0  ;;  %v534_v14 = vpack.i.bf16 %v48_v10, %v50_v8 }
  0x16   :  { %530 = vrot.lane.b32.xlu2 %v529_v11, %s593_s0 }
  0x1a   :  { %v74_v12 = vld.sshfl [vmem:[#allocation1 + $0x18] sm:$0xff pattern:$0x75316420]  ;;  %v73_v13 = vld.sshfl [vmem:[#allocation1 + $0x10] sm:$0xff pattern:$0x75316420] }
  0x1b   :  { %94 = vst [vmem:[#allocation1 + $0x10] ss:$2 sm:$0xff] %v629_v1 }
  0x1c   :  { %v72_v15 = vld.sshfl [vmem:[#allocation1 + $0x8] sm:$0xff pattern:$0x75316420]  ;;  %v71_v16 = vld.sshfl [vmem:[#allocation1] sm:$0xff pattern:$0x75316420] }
  0x1d   :  { %v544_v17 = vpack.i.bf16 %v72_v15, %v74_v12  ;;  %v539_v18 = vpack.i.bf16 %v73_v13, %v71_v16  ;;  %92 = vst [vmem:[#allocation1] ss:$2 sm:$0xff] %v624_v0 }
  0x1e   :  { %535 = vrot.lane.b32.xlu2 %v534_v14, %s593_s0 }
  0x1f   :  { %545 = vrot.lane.b32.xlu1 %v544_v17, %s594_s17  ;;  %540 = vrot.lane.b32.xlu0 %v539_v18, %s594_s17 }
  0x22   :  { %v97_v19 = vld.sshfl [vmem:[#allocation1 + $0x10] sm:$0xff pattern:$0x75316420]  ;;  %v98_v20 = vld.sshfl [vmem:[#allocation1 + $0x18] sm:$0xff pattern:$0x75316420] }
  0x23   :  { %118 = vst [vmem:[#allocation1 + $0x10] ss:$2 sm:$0xff] %v629_v1 }
  0x24   :  { %v95_v21 = vld.sshfl [vmem:[#allocation1] sm:$0xff pattern:$0x75316420]  ;;  %v96_v22 = vld.sshfl [vmem:[#allocation1 + $0x8] sm:$0xff pattern:$0x75316420] }
  0x25   :  { %v549_v23 = vpack.i.bf16 %v97_v19, %v95_v21  ;;  %116 = vst [vmem:[#allocation1] ss:$2 sm:$0xff] %v624_v0  ;;  %v554_v24 = vpack.i.bf16 %v96_v22, %v98_v20 }
  0x27   :  { %550 = vrot.lane.b32.xlu1 %v549_v23, %s595_s18  ;;  %555 = vrot.lane.b32.xlu2 %v554_v24, %s595_s18 }
  0x2a   :  { %v121_v25 = vld.sshfl [vmem:[#allocation1 + $0x10] sm:$0xff pattern:$0x75316420]  ;;  %v122_v26 = vld.sshfl [vmem:[#allocation1 + $0x18] sm:$0xff pattern:$0x75316420] }
  0x2b   :  { %142 = vst [vmem:[#allocation1 + $0x10] ss:$2 sm:$0xff] %v629_v1 }
  0x2c   :  { %v119_v27 = vld.sshfl [vmem:[#allocation1] sm:$0xff pattern:$0x75316420]  ;;  %v120_v28 = vld.sshfl [vmem:[#allocation1 + $0x8] sm:$0xff pattern:$0x75316420] }
  0x2d   :  { %v559_v29 = vpack.i.bf16 %v121_v25, %v119_v27  ;;  %140 = vst [vmem:[#allocation1] ss:$2 sm:$0xff] %v624_v0  ;;  %v564_v32 = vpack.i.bf16 %v120_v28, %v122_v26 }
  0x2f   :  { %560 = vrot.lane.b32.xlu0 %v559_v29, %s596_s19 }
  0x32   :  { %v145_v30 = vld.sshfl [vmem:[#allocation1 + $0x10] sm:$0xff pattern:$0x75316420]  ;;  %v146_v31 = vld.sshfl [vmem:[#allocation1 + $0x18] sm:$0xff pattern:$0x75316420] }
  0x33   :  { %166 = vst [vmem:[#allocation1 + $0x10] ss:$2 sm:$0xff] %v629_v1 }
  0x34   :  { %v143_v33 = vld.sshfl [vmem:[#allocation1] sm:$0xff pattern:$0x75316420]  ;;  %v144_v34 = vld.sshfl [vmem:[#allocation1 + $0x8] sm:$0xff pattern:$0x75316420] }
  0x35   :  { %v569_v35 = vpack.i.bf16 %v145_v30, %v143_v33  ;;  %164 = vst [vmem:[#allocation1] ss:$2 sm:$0xff] %v624_v0  ;;  %v574_v38 = vpack.i.bf16 %v144_v34, %v146_v31 }
  0x37   :  { %565 = vrot.lane.b32.xlu0 %v564_v32, %s596_s19  ;;  %570 = vrot.lane.b32.xlu1 %v569_v35, %s597_s20 }
  0x3a   :  { %v169_v36 = vld.sshfl [vmem:[#allocation1 + $0x10] sm:$0xff pattern:$0x75316420]  ;;  %v170_v37 = vld.sshfl [vmem:[#allocation1 + $0x18] sm:$0xff pattern:$0x75316420] }
  0x3b   :  { %190 = vst [vmem:[#allocation1 + $0x10] ss:$2 sm:$0xff] %v629_v1 }
  0x3c   :  { %v168_v39 = vld.sshfl [vmem:[#allocation1 + $0x8] sm:$0xff pattern:$0x75316420]  ;;  %v167_v40 = vld.sshfl [vmem:[#allocation1] sm:$0xff pattern:$0x75316420] }
  0x3d   :  { %v584_v41 = vpack.i.bf16 %v168_v39, %v170_v37  ;;  %188 = vst [vmem:[#allocation1] ss:$2 sm:$0xff] %v624_v0  ;;  %v579_v42 = vpack.i.bf16 %v169_v36, %v167_v40 }
  0x3f   :  { %575 = vrot.lane.b32.xlu1 %v574_v38, %s597_s20  ;;  %585 = vrot.lane.b32.xlu0 %v584_v41, %s598_s21 }
  0x40   :  { %580 = vrot.lane.b32.xlu2 %v579_v42, %s598_s21 }
  0x42   :  { %v193_v43 = vld.sshfl [vmem:[#allocation1 + $0x10] sm:$0xff pattern:$0x75316420]  ;;  %v194_v44 = vld.sshfl [vmem:[#allocation1 + $0x18] sm:$0xff pattern:$0x75316420] }
  0x43   :  { %214 = vst [vmem:[#allocation1 + $0x10] ss:$2 sm:$0xff] %v629_v1 }
  0x44   :  { %v191_v45 = vld.sshfl [vmem:[#allocation1] sm:$0xff pattern:$0x75316420]  ;;  %v192_v46 = vld.sshfl [vmem:[#allocation1 + $0x8] sm:$0xff pattern:$0x75316420] }
  0x45   :  { %212 = vst [vmem:[#allocation1] ss:$2 sm:$0xff] %v624_v0 }
  0x47   :  { %203 = vrot.lane.b32.xlu1 %v193_v43, %s599_s22  ;;  %199 = vrot.lane.b32.xlu0 %v191_v45, %s599_s22 }
  0x48   :  { %205 = vrot.lane.b32.xlu2 %v194_v44, %s599_s22 }
  0x4f   :  { %35 = vrot.lane.b32.xlu1 %v635_v5, %s592_s16  ;;  %31 = vrot.lane.b32.xlu0 %v633_v3, %s592_s16 }
  0x50   :  { %201 = vrot.lane.b32.xlu2 %v192_v46, %s599_s22 }
  0x70   :  { %v531_v47 = vpop.permute.xlu2 %530 }
  0x71   :  { %v533_v55 = vunpack.i.h.bf16 %v531_v47  ;;  %v532_v56 = vunpack.i.l.bf16 %v531_v47 }
  0x78   :  { %v536_v49 = vpop.permute.xlu2 %535 }
  0x79   :  { %v538_v57 = vunpack.i.h.bf16 %v536_v49  ;;  %v537_v63 = vunpack.i.l.bf16 %v536_v49 }
  0x7b   :  { %v668_v2 = vsel %vm63_vm0, %v538_v57, %v533_v55  ;;  %v670_v3 = vsel %vm63_vm0, %v532_v56, %v538_v57  ;;  %v672_v6 = vsel %vm63_vm0, %v533_v55, %v537_v63  ;;  %v675_v8 = vsel %vm63_vm0, %v537_v63, %v532_v56  ;;  %v345_v57 = vld [vmem:[%s871_s2 + $0x8] sm:$0xff] }
  0x7c   :  { %v239_v9 = vrot.slane %v670_v3, 2  ;;  %v240_v10 = vrot.slane %v668_v2, 2  ;;  %v241_v18 = vrot.slane %v672_v6, 2  ;;  %v242_v21 = vrot.slane %v675_v8, 2  ;;  %v343_v2 = vld [vmem:[%s872_s1 + $0x8] sm:$0xff] }
  0x7f   :  { %v658_v48 = vpop.permute.xlu0 %525 }
  0x81   :  { %v556_v53 = vpop.permute.xlu2 %555 }
  0x82   :  { %v558_v11 = vunpack.i.h.bf16 %v556_v53  ;;  %v557_v20 = vunpack.i.l.bf16 %v556_v53 }
  0x91   :  { %v546_v50 = vpop.permute.xlu1 %545  ;;  %v541_v51 = vpop.permute.xlu0 %540 }
  0x92   :  { %v548_v60 = vunpack.i.h.bf16 %v546_v50  ;;  %v543_v61 = vunpack.i.h.bf16 %v541_v51  ;;  %v542_v62 = vunpack.i.l.bf16 %v541_v51  ;;  %v547_v0 = vunpack.i.l.bf16 %v546_v50 }
  0x94   :  { %v89_v4 = vsel %vm87_vm1, %v548_v60, %v543_v61  ;;  %v90_v5 = vsel %vm87_vm1, %v542_v62, %v548_v60  ;;  %v88_v7 = vsel %vm87_vm1, %v543_v61, %v547_v0  ;;  %v679_v13 = vsel %vm87_vm1, %v547_v0, %v542_v62 }
  0x95   :  { %v252_v12 = vrot.slane %v89_v4, 7  ;;  %v251_v14 = vrot.slane %v90_v5, 7  ;;  %v253_v19 = vrot.slane %v88_v7, 7  ;;  %v254_v23 = vrot.slane %v679_v13, 7 }
  0x96   :  { %v600_v62 = vmov 0  }
  0x97   :  { %v696_v28 = vsel %vm317_vm3, %v239_v9, %v251_v14  ;;  %v701_v29 = vsel %vm317_vm3, %v240_v10, %v252_v12  ;;  %v712_v33 = vsel %vm317_vm3, %v241_v18, %v253_v19  ;;  %589 = vset.pattern.permute.xlu1 %v600_v62  ;;  %590 = vset.pattern.permute.xlu2 %v600_v62 }
  0x98   :  { %348 = vperm.xlu1 %589, %v344_v52   ;;  %353 = vperm.xlu2 %590, %v345_v57  }
  0x99   :  { %v551_v58 = vpop.permute.xlu1 %550  ;;  %591 = vset.pattern.permute.xlu0 %v600_v62 }
  0x9a   :  { %v666_v1 = vpop.permute.xlu2 %580  ;;  %v553_v15 = vunpack.i.h.bf16 %v551_v58  ;;  %v552_v22 = vunpack.i.l.bf16 %v551_v58 }
  0x9b   :  { %v583_v35 = vunpack.i.h.bf16 %v666_v1  ;;  %v582_v36 = vunpack.i.l.bf16 %v666_v1 }
  0x9c   :  { %v689_v25 = vsel %vm111_vm2, %v558_v11, %v553_v15  ;;  %v705_v30 = vsel %vm111_vm2, %v553_v15, %v557_v20  ;;  %v716_v34 = vsel %vm111_vm2, %v552_v22, %v558_v11  ;;  %v724_v38 = vsel %vm111_vm2, %v557_v20, %v552_v22 }
  0x9d   :  { %v264_v37 = vrot.slane %v689_v25, 4  ;;  %v265_v41 = vrot.slane %v705_v30, 4  ;;  %v263_v14 = vrot.slane %v716_v34, 4  ;;  %v266_v15 = vrot.slane %v724_v38, 4 }
  0x9e   :  { %v528_v30 = vunpack.i.h.bf16 %v658_v48 }
  0xa1   :  { %v662_v59 = vpop.permute.xlu0 %560 }
  0xa2   :  { %v691_v27 = vpop.permute.xlu2 %205  ;;  %v563_v31 = vunpack.i.h.bf16 %v662_v59  ;;  %v562_v32 = vunpack.i.l.bf16 %v662_v59 }
  0xa9   :  { %v566_v16 = vpop.permute.xlu0 %565  ;;  %v571_v17 = vpop.permute.xlu1 %570 }
  0xaa   :  { %v568_v24 = vunpack.i.h.bf16 %v566_v16  ;;  %v567_v26 = vunpack.i.l.bf16 %v566_v16  ;;  %v573_v43 = vunpack.i.h.bf16 %v571_v17  ;;  %v572_v44 = vunpack.i.l.bf16 %v571_v17  ;;  %v202_v19 = vpop.permute.xlu2 %201 }
  0xac   :  { %v728_v39 = vsel %vm135_vm4, %v568_v24, %v563_v31  ;;  %v732_v40 = vsel %vm135_vm4, %v562_v32, %v568_v24  ;;  %v737_v42 = vsel %vm135_vm4, %v563_v31, %v567_v26  ;;  %v744_v53 = vsel %vm135_vm4, %v567_v26, %v562_v32 }
  0xad   :  { %v275_v55 = vrot.slane %v732_v40, 1  ;;  %v276_v56 = vrot.slane %v728_v39, 1  ;;  %v277_v16 = vrot.slane %v737_v42, 1  ;;  %v278_v17 = vrot.slane %v744_v53, 1 }
  0xae   :  { %v216_v53 = vld.sshfl [vmem:[#allocation1 + $0x8] sm:$0xff pattern:$0x75316420] }
  0xb1   :  { %v576_v45 = vpop.permute.xlu1 %575  ;;  %v586_v46 = vpop.permute.xlu0 %585 }
  0xb2   :  { %v578_v47 = vunpack.i.h.bf16 %v576_v45  ;;  %v577_v49 = vunpack.i.l.bf16 %v576_v45  ;;  %v588_v50 = vunpack.i.h.bf16 %v586_v46  ;;  %v587_v51 = vunpack.i.l.bf16 %v586_v46 }
  0xb3   :  { %v321_v45 = vsel %vm317_vm3, %v242_v21, %v254_v23  ;;  %v325_v23 = vsel %vm322_vm10, %v712_v33, %v265_v41  ;;  %v527_v33 = vunpack.i.l.bf16 %v658_v48  ;;  %v215_v41 = vld.sshfl [vmem:[#allocation1] sm:$0xff pattern:$0x75316420] }
  0xb4   :  { %v160_v58 = vsel %vm159_vm5, %v573_v43, %v577_v49  ;;  %v161_v59 = vsel %vm159_vm5, %v578_v47, %v573_v43  ;;  %v162_v60 = vsel %vm159_vm5, %v572_v44, %v578_v47  ;;  %v163_v61 = vsel %vm159_vm5, %v577_v49, %v572_v44 }
  0xb5   :  { %v287_v63 = vrot.slane %v162_v60, 6  ;;  %v288_v0 = vrot.slane %v161_v59, 6  ;;  %v289_v1 = vrot.slane %v160_v58, 6  ;;  %v290_v4 = vrot.slane %v163_v61, 6 }
  0xb6   :  { %v186_v5 = vsel %vm183_vm6, %v582_v36, %v588_v50  ;;  %v185_v7 = vsel %vm183_vm6, %v588_v50, %v583_v35  ;;  %v184_v11 = vsel %vm183_vm6, %v583_v35, %v587_v51  ;;  %v187_v12 = vsel %vm183_vm6, %v587_v51, %v582_v36  ;;  %v217_v59 = vld.sshfl [vmem:[#allocation1 + $0x10] sm:$0xff pattern:$0x75316420]  ;;  %v218_v60 = vld.sshfl [vmem:[#allocation1 + $0x18] sm:$0xff pattern:$0x75316420] }
  0xb7   :  { %v299_v20 = vrot.slane %v186_v5, 3  ;;  %v333_v22 = vsel %vm332_vm7, %v275_v55, %v287_v63  ;;  %v300_v24 = vrot.slane %v185_v7, 3  ;;  %v334_v26 = vsel %vm332_vm7, %v276_v56, %v288_v0 }
  0xb8   :  { %v301_v35 = vrot.slane %v184_v11, 3  ;;  %v335_v36 = vsel %vm332_vm7, %v277_v16, %v289_v1  ;;  %v302_v34 = vrot.slane %v187_v12, 3  ;;  %v336_v38 = vsel %vm332_vm7, %v278_v17, %v290_v4 }
  0xb9   :  { %v204_v31 = vpop.permute.xlu1 %203  ;;  %v200_v32 = vpop.permute.xlu0 %199  ;;  %v323_v44 = vsel %vm322_vm10, %v696_v28, %v263_v14  ;;  %v339_v46 = vsel %vm337_vm11, %v334_v26, %v300_v24  ;;  %v324_v28 = vsel %vm322_vm10, %v701_v29, %v264_v37  ;;  %v326_v50 = vsel %vm322_vm10, %v321_v45, %v266_v15  ;;  %v342_v14 = vld [vmem:[%s872_s1] sm:$0xff] }
  0xba   :  { %v210_v39 = vsel %vm207_vm8, %v200_v32, %v202_v19  ;;  %v209_v40 = vsel %vm207_vm8, %v202_v19, %v204_v31  ;;  %v208_v42 = vsel %vm207_vm8, %v204_v31, %v691_v27  ;;  %v211_v43 = vsel %vm207_vm8, %v691_v27, %v200_v32 }
  0xbb   :  { %503 = vmatpush.msk.msra.mxu0 %vm307_vm9, %v210_v39  ;;  %506 = vmatpush.msk.msra.mxu1 %vm307_vm9, %v209_v40  ;;  %v338_v27 = vsel %vm337_vm11, %v333_v22, %v299_v20  ;;  %v340_v13 = vsel %vm337_vm11, %v335_v36, %v301_v35  ;;  %v341_v47 = vsel %vm337_vm11, %v336_v38, %v302_v34 }
  0xbc   :  { %509 = vmatpush.msk.msra.mxu2 %vm307_vm9, %v208_v42  ;;  %512 = vmatpush.msk.msra.mxu3 %vm307_vm9, %v211_v43  ;;  %v328_v49 = vsel %vm327_vm12, %v323_v44, %v275_v55  ;;  %v329_v25 = vsel %vm327_vm12, %v324_v28, %v276_v56  ;;  %v330_v29 = vsel %vm327_vm12, %v325_v23, %v277_v16 }
  0xbd   :  { %388 = vmatpush.msra.mxu0 %v338_v27  ;;  %411 = vmatpush.msra.mxu1 %v339_v46  ;;  %v331_v37 = vsel %vm327_vm12, %v326_v50, %v278_v17 }
  0xbe   :  { %434 = vmatpush.msra.mxu2 %v340_v13  ;;  %457 = vmatpush.msra.mxu3 %v341_v47 }
  0xbf   :  { %389 = vmatpush.msra.mxu0 %v328_v49  ;;  %412 = vmatpush.msra.mxu1 %v329_v25 }
  0xc0   :  { %435 = vmatpush.msra.mxu2 %v330_v29  ;;  %458 = vmatpush.msra.mxu3 %v331_v37 }
  0xc1   :  { %v36_v51 = vpop.permute.xlu1 %35  ;;  %v32_v52 = vpop.permute.xlu0 %31 }
  0xc2   :  { %v40_v55 = vsel %vm39_vm13, %v528_v30, %v36_v51  ;;  %v43_v56 = vsel %vm39_vm13, %v36_v51, %v527_v33  ;;  %v41_v57 = vsel %vm39_vm13, %v32_v52, %v528_v30  ;;  %v42_v58 = vsel %vm39_vm13, %v527_v33, %v32_v52 }
  0xc3   :  { %v229_v61 = vrot.slane %v40_v55, 5  ;;  %v230_v62 = vrot.slane %v43_v56, 5  ;;  %v227_v54 = vrot.slane %v42_v58, 5  ;;  %v228_v63 = vrot.slane %v41_v57, 5 }
  0xc5   :  { %v308_v48 = vsel %vm307_vm9, %v215_v41, %v227_v54  ;;  %v309_v0 = vsel %vm307_vm9, %v216_v53, %v228_v63  ;;  %v310_v1 = vsel %vm307_vm9, %v217_v59, %v229_v61  ;;  %v311_v4 = vsel %vm307_vm9, %v218_v60, %v230_v62 }
  0xc6   :  { %v313_v5 = vsel %vm312_vm14, %v308_v48, %v239_v9  ;;  %v314_v7 = vsel %vm312_vm14, %v309_v0, %v240_v10  ;;  %v315_v11 = vsel %vm312_vm14, %v310_v1, %v241_v18  ;;  %v316_v12 = vsel %vm312_vm14, %v311_v4, %v242_v21 }
  0xc7   :  { %390 = vmatpush.msra.mxu0 %v313_v5  ;;  %413 = vmatpush.msra.mxu1 %v314_v7 }
  0xc8   :  { %436 = vmatpush.msra.mxu2 %v315_v11  ;;  %459 = vmatpush.msra.mxu3 %v316_v12 }
  0xc9   :  { %510 = vmatmul.msk.f32.vlgmr.msra.gmra.mxu2 %vm356_vm15, %v342_v14  ;;  %513 = vmatmul.msk.f32.vlgmr.msra.gmra.mxu3 %vm356_vm15, %v342_v14 }
  0xca   :  { %504 = vmatmul.msk.f32.vlgmr.msra.gmra.mxu0 %vm356_vm15, %v342_v14  ;;  %507 = vmatmul.msk.f32.vlgmr.msra.gmra.mxu1 %vm356_vm15, %v342_v14 }
  0xd1   :  { %511 = vmatmul.msk.f32.gmra.mxu2 %vm356_vm15, %v343_v2  ;;  %514 = vmatmul.msk.f32.gmra.mxu3 %vm356_vm15, %v343_v2 }
  0xd2   :  { %505 = vmatmul.msk.f32.gmra.mxu0 %vm356_vm15, %v343_v2  ;;  %508 = vmatmul.msk.f32.gmra.mxu1 %vm356_vm15, %v343_v2 }
  0xf2   :  { %v354_v24 = vpop.permute.xlu2 %353 }
 0x10a   :  { %v349_v3 = vpop.permute.xlu1 %348 }
 0x147   :  { %v392_v6 = vpop.f32.mrf.mxu0  ;;  %v415_v8 = vpop.f32.mrf.mxu1 }
 0x148   :  { %v393_v9 = vadd.f32 %v392_v6, %v349_v3  ;;  %v416_v10 = vadd.f32 %v415_v8, %v349_v3 }
 0x14a   :  { %vm467_vm0 = vcmp.gt.f32.partialorder %v393_v9, 0.0  ;;  %v475_v18 = vmul.f32 0.01, %v393_v9  ;;  %vm468_vm1 = vcmp.gt.f32.partialorder %v416_v10, 0.0  ;;  %v476_v21 = vmul.f32 0.01, %v416_v10 }
 0x14c   :  { %v483_v15 = vsel %vm467_vm0, %v393_v9, %v475_v18  ;;  %v484_v16 = vsel %vm468_vm1, %v416_v10, %v476_v21  ;;  %v438_v17 = vpop.f32.mrf.mxu2  ;;  %v461_v19 = vpop.f32.mrf.mxu3 }
 0x14d   :  { %491 = vst [vmem:[%s873_s3] sm:$0xff] %v483_v15  ;;  %v439_v20 = vadd.f32 %v438_v17, %v349_v3  ;;  %v462_v22 = vadd.f32 %v461_v19, %v349_v3 }
 0x14e   :  { %492 = vst [vmem:[%s873_s3 + $0x8] sm:$0xff] %v484_v16 }
 0x14f   :  { %vm469_vm2 = vcmp.gt.f32.partialorder %v439_v20, 0.0  ;;  %v477_v26 = vmul.f32 0.01, %v439_v20  ;;  %vm470_vm3 = vcmp.gt.f32.partialorder %v462_v22, 0.0  ;;  %v478_v31 = vmul.f32 0.01, %v462_v22  ;;  %v395_v32 = vpop.f32.mrf.mxu0  ;;  %v418_v35 = vpop.f32.mrf.mxu1 }
 0x150   :  { %v396_v36 = vadd.f32 %v395_v32, %v354_v24  ;;  %v419_v34 = vadd.f32 %v418_v35, %v354_v24 }
 0x151   :  { %v485_v38 = vsel %vm469_vm2, %v439_v20, %v477_v26  ;;  %v486_v39 = vsel %vm470_vm3, %v462_v22, %v478_v31 }
 0x152   :  { %493 = vst [vmem:[%s873_s3 + $0x10] sm:$0xff] %v485_v38  ;;  %vm471_vm4 = vcmp.gt.f32.partialorder %v396_v36, 0.0  ;;  %v479_v40 = vmul.f32 0.01, %v396_v36  ;;  %vm472_vm5 = vcmp.gt.f32.partialorder %v419_v34, 0.0 }
 0x153   :  { %494 = vst [vmem:[%s873_s3 + $0x18] sm:$0xff] %v486_v39  ;;  %v480_v42 = vmul.f32 0.01, %v419_v34 }
 0x154   :  { %v487_v43 = vsel %vm471_vm4, %v396_v36, %v479_v40  ;;  %v441_v44 = vpop.f32.mrf.mxu2  ;;  %v464_v45 = vpop.f32.mrf.mxu3 }
 0x155   :  { %495 = vst [vmem:[%s873_s3 + $0x20] sm:$0xff] %v487_v43  ;;  %v488_v27 = vsel %vm472_vm5, %v419_v34, %v480_v42  ;;  %v442_v46 = vadd.f32 %v441_v44, %v354_v24  ;;  %v465_v28 = vadd.f32 %v464_v45, %v354_v24 }
 0x156   :  { %496 = vst [vmem:[%s873_s3 + $0x28] sm:$0xff] %v488_v27 }
 0x157   :  { %vm473_vm6 = vcmp.gt.f32.partialorder %v442_v46, 0.0  ;;  %v481_v13 = vmul.f32 0.01, %v442_v46  ;;  %vm474_vm7 = vcmp.gt.f32.partialorder %v465_v28, 0.0  ;;  %v482_v47 = vmul.f32 0.01, %v465_v28 }
 0x159   :  { %v489_v23 = vsel %vm473_vm6, %v442_v46, %v481_v13  ;;  %v490_v49 = vsel %vm474_vm7, %v465_v28, %v482_v47 }
 0x15a   :  { %497 = vst [vmem:[%s873_s3 + $0x30] sm:$0xff] %v489_v23 }
 0x15b   :  { %498 = vst [vmem:[%s873_s3 + $0x38] sm:$0xff] %v490_v49 }

</bundles_post_ra>
